<compile_context>
chip_gen: v5e
topology: v5e:2x2
jax: 0.10.0
libtpu: 0.0.40
codegen_flags: <defaults>
</compile_context>

<pallas_src>
import math
from functools import partial

import numpy as np
import jax
import jax.numpy as jnp
from jax.experimental import pallas as pl
from jax.experimental.pallas import tpu as pltpu


_SQRT_2_OVER_PI = math.sqrt(2.0 / math.pi)


# ----------------------------- kernel helpers -------------------------------

def _layernorm_f32(x, g, b, eps):
    mu = jnp.mean(x, axis=-1, keepdims=True)
    xc = x - mu
    var = jnp.mean(xc * xc, axis=-1, keepdims=True)
    return xc * jax.lax.rsqrt(var + eps) * g + b


def _gelu_tanh(y):
    return 0.5 * y * (1.0 + jnp.tanh(_SQRT_2_OVER_PI * (y + 0.044715 * y * y * y)))


# ------------------------------ Pallas kernels ------------------------------

def _ln_qkv_kernel(x_ref, g_ref, b_ref, wqkv_ref, qkv_ref, *, eps):
    """qkv = LayerNorm(x) @ Wqkv (no bias, qkv_bias=False)."""
    x = x_ref[...].astype(jnp.float32)
    h = _layernorm_f32(x, g_ref[...], b_ref[...], eps)
    qkv_ref[...] = jnp.dot(h.astype(wqkv_ref.dtype), wqkv_ref[...],
                           preferred_element_type=jnp.float32).astype(qkv_ref.dtype)


def _skip_ln_qkv_kernel(x_ref, s_ref, wx_ref, ws_ref, bs_ref, g_ref, b_ref,
                        wqkv_ref, qkv_ref, x2_ref, *, eps):
    """x2 = [x, skip] @ Wskip.T + b (no concat materialized);
       qkv = LayerNorm(x2) @ Wqkv.  Emits x2 for the later residual."""
    x2 = (jnp.dot(x_ref[...], wx_ref[...], preferred_element_type=jnp.float32)
          + jnp.dot(s_ref[...], ws_ref[...], preferred_element_type=jnp.float32)
          + bs_ref[...])
    x2_ref[...] = x2.astype(x2_ref.dtype)
    h = _layernorm_f32(x2, g_ref[...], b_ref[...], eps)
    qkv_ref[...] = jnp.dot(h.astype(wqkv_ref.dtype), wqkv_ref[...],
                           preferred_element_type=jnp.float32).astype(qkv_ref.dtype)


def _attn_kernel(qkv_ref, o_ref, *, num_heads, head_dim, scale):
    """Softmax attention for one batch (all heads), reading the (L, 3C) qkv
    block in 'B L (K H D)' layout and writing the (L, C) output in
    'B L (H D)' layout (no XLA transposes)."""
    c = num_heads * head_dim
    for h in range(num_heads):
        q = qkv_ref[:, h * head_dim:(h + 1) * head_dim]
        k = qkv_ref[:, c + h * head_dim:c + (h + 1) * head_dim]
        v = qkv_ref[:, 2 * c + h * head_dim:2 * c + (h + 1) * head_dim]
        s = jax.lax.dot_general(q, k, (((1,), (1,)), ((), ())),
                                preferred_element_type=jnp.float32) * scale
        m = jnp.max(s, axis=-1, keepdims=True)
        p = jnp.exp(s - m)
        inv = pl.reciprocal(jnp.sum(p, axis=-1, keepdims=True), approx=True)
        p = p * inv
        o = jax.lax.dot_general(p.astype(v.dtype), v, (((1,), (0,)), ((), ())),
                                preferred_element_type=jnp.float32)
        o_ref[:, h * head_dim:(h + 1) * head_dim] = o.astype(o_ref.dtype)


def _proj_res_ln_fc1_kernel(a_ref, wp_ref, bp_ref, res_ref, g_ref, b_ref,
                            w1_ref, b1_ref, h_ref, xmid_ref, *, eps):
    """xmid = attn @ Wproj + bp + res;  h = GELU_tanh(LayerNorm(xmid) @ W1 + b1)."""
    xm = (jnp.dot(a_ref[...], wp_ref[...], preferred_element_type=jnp.float32)
          + bp_ref[...] + res_ref[...].astype(jnp.float32))
    xmid_ref[...] = xm.astype(xmid_ref.dtype)
    y = _layernorm_f32(xm, g_ref[...], b_ref[...], eps)
    u = jnp.dot(y.astype(w1_ref.dtype), w1_ref[...],
                preferred_element_type=jnp.float32) + b1_ref[...]
    h_ref[...] = _gelu_tanh(u).astype(h_ref.dtype)


def _fc2_res_kernel(h_ref, w2_ref, b2_ref, res_ref, o_ref):
    """o = h @ W2 + b2 + res."""
    y = (jnp.dot(h_ref[...], w2_ref[...], preferred_element_type=jnp.float32)
         + b2_ref[...] + res_ref[...].astype(jnp.float32))
    o_ref[...] = y.astype(o_ref.dtype)


# ------------------------------ call wrappers --------------------------------

def _row_tile(m, itemsize=4):
    """Row tile: sublane-aligned, capped at 256, aiming for >=4 grid steps
    (>=2 per TensorCore on v7x) when M is large enough."""
    sub = 16 if itemsize < 4 else 8
    tm = -(-m // 4)
    tm = -(-tm // sub) * sub
    return max(sub, min(tm, 256))


def _vmem_limit(blocks):
    """Scoped-VMEM limit from per-step block footprint (double-buffered + slack)."""
    per_step = sum(int(np.prod(s)) * np.dtype(d).itemsize for s, d in blocks)
    return int(min(max(2 * per_step + (8 << 20), 32 << 20), 64 << 20))


def _ln_qkv(x2, gamma, beta, w_qkv, *, eps=1e-6):
    m, k = x2.shape
    n = w_qkv.shape[1]
    dt = x2.dtype
    tm = _row_tile(m, dt.itemsize)
    limit = _vmem_limit([((tm, k), dt), ((1, k), gamma.dtype), ((1, k), beta.dtype),
                         ((k, n), w_qkv.dtype), ((tm, n), dt)])
    return pl.pallas_call(
        partial(_ln_qkv_kernel, eps=eps),
        out_shape=jax.ShapeDtypeStruct((m, n), dt),
        grid=(pl.cdiv(m, tm),),
        in_specs=[
            pl.BlockSpec((tm, k), lambda i: (i, 0)),
            pl.BlockSpec((1, k), lambda i: (0, 0)),
            pl.BlockSpec((1, k), lambda i: (0, 0)),
            pl.BlockSpec((k, n), lambda i: (0, 0)),
        ],
        out_specs=pl.BlockSpec((tm, n), lambda i: (i, 0)),
        compiler_params=pltpu.CompilerParams(
            dimension_semantics=("parallel",), vmem_limit_bytes=limit),
        cost_estimate=pl.CostEstimate(
            flops=2 * m * k * n, transcendentals=m,
            bytes_accessed=(m * k + k * n + m * n + 2 * k) * dt.itemsize),
    )(x2, gamma.reshape(1, k), beta.reshape(1, k), w_qkv)


def _skip_ln_qkv(x2, s2, wx, ws, b_skip, gamma, beta, w_qkv, *, eps=1e-6):
    m, k = x2.shape
    n = w_qkv.shape[1]
    dt = x2.dtype
    tm = _row_tile(m, dt.itemsize)
    limit = _vmem_limit([((tm, k), dt), ((tm, k), dt), ((k, k), wx.dtype),
                         ((k, k), ws.dtype), ((1, k), b_skip.dtype),
                         ((1, k), gamma.dtype), ((1, k), beta.dtype),
                         ((k, n), w_qkv.dtype), ((tm, n), dt), ((tm, k), dt)])
    return pl.pallas_call(
        partial(_skip_ln_qkv_kernel, eps=eps),
        out_shape=(jax.ShapeDtypeStruct((m, n), dt),     # qkv
                   jax.ShapeDtypeStruct((m, k), dt)),    # x2 (post-skip residual)
        grid=(pl.cdiv(m, tm),),
        in_specs=[
            pl.BlockSpec((tm, k), lambda i: (i, 0)),     # x
            pl.BlockSpec((tm, k), lambda i: (i, 0)),     # skip
            pl.BlockSpec((k, k), lambda i: (0, 0)),      # W_skip[:, :C].T
            pl.BlockSpec((k, k), lambda i: (0, 0)),      # W_skip[:, C:].T
            pl.BlockSpec((1, k), lambda i: (0, 0)),      # b_skip
            pl.BlockSpec((1, k), lambda i: (0, 0)),      # gamma1
            pl.BlockSpec((1, k), lambda i: (0, 0)),      # beta1
            pl.BlockSpec((k, n), lambda i: (0, 0)),      # W_qkv.T
        ],
        out_specs=(pl.BlockSpec((tm, n), lambda i: (i, 0)),
                   pl.BlockSpec((tm, k), lambda i: (i, 0))),
        compiler_params=pltpu.CompilerParams(
            dimension_semantics=("parallel",), vmem_limit_bytes=limit),
        cost_estimate=pl.CostEstimate(
            flops=4 * m * k * k + 2 * m * k * n, transcendentals=m,
            bytes_accessed=(3 * m * k + 2 * k * k + k * n + m * n) * dt.itemsize),
    )(x2, s2, wx, ws, b_skip.reshape(1, k), gamma.reshape(1, k),
      beta.reshape(1, k), w_qkv)


def _attention(qkv2, *, batch, seq, num_heads, head_dim):
    m, n3 = qkv2.shape
    c = num_heads * head_dim
    dt = qkv2.dtype
    kern = partial(_attn_kernel, num_heads=num_heads, head_dim=head_dim,
                   scale=head_dim ** (-0.5))
    limit = _vmem_limit([((seq, n3), dt), ((seq, c), dt)])
    return pl.pallas_call(
        kern,
        out_shape=jax.ShapeDtypeStruct((m, c), dt),
        grid=(batch,),
        in_specs=[pl.BlockSpec((seq, n3), lambda b: (b, 0))],
        out_specs=pl.BlockSpec((seq, c), lambda b: (b, 0)),
        compiler_params=pltpu.CompilerParams(
            dimension_semantics=("parallel",), vmem_limit_bytes=limit),
        cost_estimate=pl.CostEstimate(
            flops=4 * batch * num_heads * seq * seq * head_dim,
            transcendentals=batch * num_heads * seq * seq,
            bytes_accessed=(m * n3 + m * c) * dt.itemsize),
    )(qkv2)


def _proj_res_ln_fc1(attn2, w_proj, b_proj, res, gamma, beta, w_fc1, b_fc1, *,
                     eps=1e-6):
    m, c = attn2.shape
    n = w_fc1.shape[1]
    dt = attn2.dtype
    tm = _row_tile(m, dt.itemsize)
    limit = _vmem_limit([((tm, c), dt), ((c, c), w_proj.dtype), ((1, c), b_proj.dtype),
                         ((tm, c), res.dtype), ((1, c), gamma.dtype), ((1, c), beta.dtype),
                         ((c, n), w_fc1.dtype), ((1, n), b_fc1.dtype),
                         ((tm, n), dt), ((tm, c), dt)])
    return pl.pallas_call(
        partial(_proj_res_ln_fc1_kernel, eps=eps),
        out_shape=(jax.ShapeDtypeStruct((m, n), dt),     # gelu(fc1) hidden
                   jax.ShapeDtypeStruct((m, c), dt)),    # xmid residual
        grid=(pl.cdiv(m, tm),),
        in_specs=[
            pl.BlockSpec((tm, c), lambda i: (i, 0)),     # attn output
            pl.BlockSpec((c, c), lambda i: (0, 0)),      # W_proj.T
            pl.BlockSpec((1, c), lambda i: (0, 0)),      # b_proj
            pl.BlockSpec((tm, c), lambda i: (i, 0)),     # residual
            pl.BlockSpec((1, c), lambda i: (0, 0)),      # gamma2
            pl.BlockSpec((1, c), lambda i: (0, 0)),      # beta2
            pl.BlockSpec((c, n), lambda i: (0, 0)),      # W_fc1.T
            pl.BlockSpec((1, n), lambda i: (0, 0)),      # b_fc1
        ],
        out_specs=(pl.BlockSpec((tm, n), lambda i: (i, 0)),
                   pl.BlockSpec((tm, c), lambda i: (i, 0))),
        compiler_params=pltpu.CompilerParams(
            dimension_semantics=("parallel",), vmem_limit_bytes=limit),
        cost_estimate=pl.CostEstimate(
            flops=2 * m * c * c + 2 * m * c * n, transcendentals=m * n + m,
            bytes_accessed=(3 * m * c + c * c + c * n + m * n) * dt.itemsize),
    )(attn2, w_proj, b_proj.reshape(1, c), res, gamma.reshape(1, c),
      beta.reshape(1, c), w_fc1, b_fc1.reshape(1, n))


def _fc2_res(h, w_fc2, b_fc2, res):
    m, k = h.shape
    n = w_fc2.shape[1]
    dt = res.dtype
    tm = _row_tile(m, dt.itemsize)
    limit = _vmem_limit([((tm, k), h.dtype), ((k, n), w_fc2.dtype),
                         ((1, n), b_fc2.dtype), ((tm, n), dt), ((tm, n), dt)])
    return pl.pallas_call(
        _fc2_res_kernel,
        out_shape=jax.ShapeDtypeStruct((m, n), dt),
        grid=(pl.cdiv(m, tm),),
        in_specs=[
            pl.BlockSpec((tm, k), lambda i: (i, 0)),
            pl.BlockSpec((k, n), lambda i: (0, 0)),
            pl.BlockSpec((1, n), lambda i: (0, 0)),
            pl.BlockSpec((tm, n), lambda i: (i, 0)),
        ],
        out_specs=pl.BlockSpec((tm, n), lambda i: (i, 0)),
        compiler_params=pltpu.CompilerParams(
            dimension_semantics=("parallel",), vmem_limit_bytes=limit),
        cost_estimate=pl.CostEstimate(
            flops=2 * m * k * n, transcendentals=0,
            bytes_accessed=(m * k + k * n + 2 * m * n) * dt.itemsize),
    )(h, w_fc2, b_fc2.reshape(1, n), res)


# --------------------------------- module ------------------------------------

class Block:
    """Pallas re-implementation of the PyTorch transformer Block (inference)."""

    def __init__(self, dim, num_heads, mlp_ratio=4.0, skip=False, key=None,
                 dtype=jnp.float32):
        assert dim % num_heads == 0
        self.dim = dim
        self.num_heads = num_heads
        self.head_dim = dim // num_heads
        self.hidden = int(dim * mlp_ratio)
        self.dtype = jnp.dtype(dtype)
        if key is None:
            key = jax.random.PRNGKey(0)
        ks = jax.random.split(key, 5)

        def linear_init(k, out_f, in_f, bias=True):
            # Matches PyTorch Linear default init bounds (kaiming_uniform a=sqrt(5)).
            bound = 1.0 / math.sqrt(in_f)
            kw, kb = jax.random.split(k)
            w = jax.random.uniform(kw, (out_f, in_f), jnp.float32,
                                   minval=-bound, maxval=bound)
            b = (jax.random.uniform(kb, (out_f,), jnp.float32,
                                    minval=-bound, maxval=bound)
                 if bias else jnp.zeros((out_f,), jnp.float32))
            return w, b

        # LayerNorms (eps=1e-6, affine default init). Kept f32 (applied in f32).
        self.g1 = jnp.ones((dim,), jnp.float32)
        self.b1 = jnp.zeros((dim,), jnp.float32)
        self.g2 = jnp.ones((dim,), jnp.float32)
        self.b2 = jnp.zeros((dim,), jnp.float32)

        # Attention: qkv (qkv_bias=False -> no bias tensor at all) and proj.
        w_qkv, _ = linear_init(ks[0], 3 * dim, dim, bias=False)
        w_proj, b_proj = linear_init(ks[1], dim, dim)
        # MLP
        w_fc1, b_fc1 = linear_init(ks[2], self.hidden, dim)
        w_fc2, b_fc2 = linear_init(ks[3], dim, self.hidden)

        # Weights pre-transposed to (K, N); stored in `dtype` (bf16 -> native MXU
        # rate, f32 accumulation inside kernels). Biases stay f32 (added to the
        # f32 accumulators).
        self.w_qkv_t = jnp.transpose(w_qkv).astype(self.dtype)   # (C, 3C)
        self.w_proj_t = jnp.transpose(w_proj).astype(self.dtype) # (C, C)
        self.b_proj = b_proj
        self.w_fc1_t = jnp.transpose(w_fc1).astype(self.dtype)   # (C, hidden)
        self.b_fc1 = b_fc1
        self.w_fc2_t = jnp.transpose(w_fc2).astype(self.dtype)   # (hidden, C)
        self.b_fc2 = b_fc2

        if skip:
            w_skip, b_skip = linear_init(ks[4], dim, 2 * dim)
            self.wx_skip_t = jnp.transpose(w_skip[:, :dim]).astype(self.dtype)
            self.ws_skip_t = jnp.transpose(w_skip[:, dim:]).astype(self.dtype)
            self.b_skip = b_skip
        else:
            self.wx_skip_t = None
            self.ws_skip_t = None
            self.b_skip = None

    def __call__(self, x, skip=None):
        B, L, C = x.shape
        assert C == self.dim
        M = B * L
        x2 = x.reshape(M, C).astype(self.dtype)

        # --- (optional skip_linear) + LN1 + QKV, fused ---
        if self.wx_skip_t is not None and skip is not None:
            qkv, x2 = _skip_ln_qkv(x2, skip.reshape(M, C).astype(self.dtype),
                                   self.wx_skip_t, self.ws_skip_t, self.b_skip,
                                   self.g1, self.b1, self.w_qkv_t)
        else:
            qkv = _ln_qkv(x2, self.g1, self.b1, self.w_qkv_t)

        # --- attention: one batch per grid step, heads sliced in-kernel,
        #     output lands directly in (M, C) = 'B L (H D)' layout ---
        attn2 = _attention(qkv, batch=B, seq=L,
                           num_heads=self.num_heads, head_dim=self.head_dim)

        # --- proj + residual + LN2 + FC1 + GELU, fused (xmid kept for fc2 res) ---
        h, xmid = _proj_res_ln_fc1(attn2, self.w_proj_t, self.b_proj, x2,
                                   self.g2, self.b2, self.w_fc1_t, self.b_fc1)

        # --- FC2 + bias + residual ---
        out = _fc2_res(h, self.w_fc2_t, self.b_fc2, xmid)
        return out.reshape(B, L, C)


# -------------------------------- reference -----------------------------------

def _block_reference(blk, x, skip=None):
    """Pure-JAX f32 reference matching the PyTorch Block forward."""
    hp = jax.lax.Precision.HIGHEST
    f32 = jnp.float32
    B, L, C = x.shape
    H, D = blk.num_heads, blk.head_dim
    x = x.astype(f32)

    def ln(z, g, b):
        mu = z.mean(-1, keepdims=True)
        var = ((z - mu) ** 2).mean(-1, keepdims=True)
        return (z - mu) * jax.lax.rsqrt(var + 1e-6) * g + b

    h = x
    if blk.wx_skip_t is not None and skip is not None:
        h = (jnp.dot(h, blk.wx_skip_t.astype(f32), precision=hp)
             + jnp.dot(skip.astype(f32), blk.ws_skip_t.astype(f32), precision=hp)
             + blk.b_skip)

    y = ln(h, blk.g1, blk.b1)
    qkv = jnp.dot(y, blk.w_qkv_t.astype(f32), precision=hp)
    qkv = qkv.reshape(B, L, 3, H, D).transpose(2, 0, 3, 1, 4)
    q, k, v = qkv[0], qkv[1], qkv[2]
    s = jnp.einsum('bhqd,bhkd->bhqk', q, k, precision=hp) * (D ** (-0.5))
    p = jax.nn.softmax(s, axis=-1)
    a = jnp.einsum('bhqk,bhkd->bhqd', p, v, precision=hp)
    a = a.transpose(0, 2, 1, 3).reshape(B, L, C)
    h = h + jnp.dot(a, blk.w_proj_t.astype(f32), precision=hp) + blk.b_proj

    y = ln(h, blk.g2, blk.b2)
    u = jnp.dot(y, blk.w_fc1_t.astype(f32), precision=hp) + blk.b_fc1
    c = math.sqrt(2.0 / math.pi)
    u = 0.5 * u * (1.0 + jnp.tanh(c * (u + 0.044715 * u ** 3)))
    h = h + jnp.dot(u, blk.w_fc2_t.astype(f32), precision=hp) + blk.b_fc2
    return h


# ----------------------------------- main -------------------------------------

if __name__ == "__main__":
    key = jax.random.PRNGKey(0)
    kx, ksk, kp1, kp2, kp3 = jax.random.split(key, 5)

    # Small shapes: batch=2, seq=16, dim=128 (lane-dense), 8 heads -> head_dim=16.
    B, L, C, H = 2, 16, 128, 8
    x = jax.random.normal(kx, (B, L, C), jnp.float32)

    # 1) f32 block without skip_linear.
    blk = Block(dim=C, num_heads=H, key=kp1)
    y = jax.block_until_ready(blk(x))
    y_ref = _block_reference(blk, x)
    assert y.shape == (B, L, C), y.shape
    err = float(jnp.max(jnp.abs(y - y_ref)))
    assert jnp.allclose(y, y_ref, atol=2e-3, rtol=2e-3), f"block mismatch {err}"

    # 2) f32 block with skip_linear.
    skip_in = jax.random.normal(ksk, (B, L, C), jnp.float32)
    blk_s = Block(dim=C, num_heads=H, skip=True, key=kp2)
    y2 = jax.block_until_ready(blk_s(x, skip_in))
    y2_ref = _block_reference(blk_s, x, skip_in)
    err2 = float(jnp.max(jnp.abs(y2 - y2_ref)))
    assert jnp.allclose(y2, y2_ref, atol=2e-3, rtol=2e-3), f"skip mismatch {err2}"

    # 3) bf16 weights/activations (f32 accumulation inside kernels), loose check.
    blk_bf = Block(dim=C, num_heads=H, key=kp3, dtype=jnp.bfloat16)
    y3 = jax.block_until_ready(blk_bf(x))
    y3_ref = _block_reference(blk_bf, x)
    err3 = float(jnp.max(jnp.abs(y3.astype(jnp.float32) - y3_ref)))
    assert jnp.allclose(y3.astype(jnp.float32), y3_ref, atol=1e-1, rtol=1e-1), \
        f"bf16 mismatch {err3}"

    print("KERNEL_OK")
</pallas_src>

<mosaic_0001>
module attributes {stable_mosaic.version = 11 : i64} {
  func.func @_ln_qkv_kernel(%arg0: i32, %arg1: memref<8x128xf32, #tpu.memory_space<vmem>>, %arg2: memref<1x128xf32, #tpu.memory_space<vmem>>, %arg3: memref<1x128xf32, #tpu.memory_space<vmem>>, %arg4: memref<128x384xf32, #tpu.memory_space<vmem>>, %arg5: memref<8x384xf32, #tpu.memory_space<vmem>>) attributes {dimension_semantics = [#tpu.dimension_semantics<parallel>], iteration_bounds = array<i64: 4>, scalar_prefetch = 0 : i64, scratch_operands = 0 : i64, tpu.core_type = #tpu.core_type<tc>, window_params = [{transform_indices = @transform_0, window_bounds = array<i64: 8, 128>}, {pipeline_mode = #tpu.pipeline_mode<synchronous>, transform_indices = @transform_1, window_bounds = array<i64: 1, 128>}, {pipeline_mode = #tpu.pipeline_mode<synchronous>, transform_indices = @transform_2, window_bounds = array<i64: 1, 128>}, {pipeline_mode = #tpu.pipeline_mode<synchronous>, transform_indices = @transform_3, window_bounds = array<i64: 128, 384>}, {transform_indices = @transform_4, window_bounds = array<i64: 8, 384>}]} {
    %c0 = arith.constant 0 : index
    %c0_0 = arith.constant 0 : index
    %0 = vector.load %arg1[%c0, %c0_0] : memref<8x128xf32, #tpu.memory_space<vmem>>, vector<8x128xf32>
    %c0_1 = arith.constant 0 : index
    %c0_2 = arith.constant 0 : index
    %1 = vector.load %arg2[%c0_1, %c0_2] : memref<1x128xf32, #tpu.memory_space<vmem>>, vector<1x128xf32>
    %c0_3 = arith.constant 0 : index
    %c0_4 = arith.constant 0 : index
    %2 = vector.load %arg3[%c0_3, %c0_4] : memref<1x128xf32, #tpu.memory_space<vmem>>, vector<1x128xf32>
    %cst = arith.constant dense<0.000000e+00> : vector<8xf32>
    %3 = vector.multi_reduction <add>, %0, %cst [1] : vector<8x128xf32> to vector<8xf32>
    %4 = vector.shape_cast %3 : vector<8xf32> to vector<8x1xf32>
    %cst_5 = arith.constant 1.280000e+02 : f32
    %5 = vector.broadcast %cst_5 : f32 to vector<8x1xf32>
    %6 = arith.divf %4, %5 : vector<8x1xf32>
    %7 = vector.broadcast %6 : vector<8x1xf32> to vector<8x128xf32>
    %8 = arith.subf %0, %7 : vector<8x128xf32>
    %9 = arith.mulf %8, %8 : vector<8x128xf32>
    %cst_6 = arith.constant dense<0.000000e+00> : vector<8xf32>
    %10 = vector.multi_reduction <add>, %9, %cst_6 [1] : vector<8x128xf32> to vector<8xf32>
    %11 = vector.shape_cast %10 : vector<8xf32> to vector<8x1xf32>
    %cst_7 = arith.constant 1.280000e+02 : f32
    %12 = vector.broadcast %cst_7 : f32 to vector<8x1xf32>
    %13 = arith.divf %11, %12 : vector<8x1xf32>
    %cst_8 = arith.constant 9.99999997E-7 : f32
    %14 = vector.broadcast %cst_8 : f32 to vector<8x1xf32>
    %15 = arith.addf %13, %14 : vector<8x1xf32>
    %16 = math.rsqrt %15 : vector<8x1xf32>
    %17 = vector.broadcast %16 : vector<8x1xf32> to vector<8x128xf32>
    %18 = arith.mulf %8, %17 : vector<8x128xf32>
    %19 = vector.broadcast %1 : vector<1x128xf32> to vector<8x128xf32>
    %20 = arith.mulf %18, %19 : vector<8x128xf32>
    %21 = vector.broadcast %2 : vector<1x128xf32> to vector<8x128xf32>
    %22 = arith.addf %20, %21 : vector<8x128xf32>
    %c0_9 = arith.constant 0 : index
    %c0_10 = arith.constant 0 : index
    %23 = vector.load %arg4[%c0_9, %c0_10] : memref<128x384xf32, #tpu.memory_space<vmem>>, vector<128x384xf32>
    %cst_11 = arith.constant dense<0.000000e+00> : vector<8x384xf32>
    %24 = tpu.matmul %22, %23, %cst_11 {dimension_numbers = #tpu.dot_dimension_numbers<[1], [0], [0], [1], [0, 0, 1, 1], [], []>} : vector<8x128xf32>, vector<128x384xf32>, vector<8x384xf32> -> vector<8x384xf32>
    %c0_12 = arith.constant 0 : index
    %c0_13 = arith.constant 0 : index
    %25 = vector.load %arg5[%c0_12, %c0_13] : memref<8x384xf32, #tpu.memory_space<vmem>>, vector<8x384xf32>
    tpu.vector_store %arg5[%c0_12, %c0_13], %24 {strides = array<i32>} : memref<8x384xf32, #tpu.memory_space<vmem>>, vector<8x384xf32>,
    return
  }
  func.func @transform_0(%arg0: i32) -> (i32, i32) {
    %c0_i32 = arith.constant 0 : i32
    %c0_i32_0 = arith.constant 0 : i32
    return %arg0, %c0_i32 : i32, i32
  }
  func.func @transform_1(%arg0: i32) -> (i32, i32) {
    %c0_i32 = arith.constant 0 : i32
    %c0_i32_0 = arith.constant 0 : i32
    %c0_i32_1 = arith.constant 0 : i32
    return %c0_i32, %c0_i32_0 : i32, i32
  }
  func.func @transform_2(%arg0: i32) -> (i32, i32) {
    %c0_i32 = arith.constant 0 : i32
    %c0_i32_0 = arith.constant 0 : i32
    %c0_i32_1 = arith.constant 0 : i32
    return %c0_i32, %c0_i32_0 : i32, i32
  }
  func.func @transform_3(%arg0: i32) -> (i32, i32) {
    %c0_i32 = arith.constant 0 : i32
    %c0_i32_0 = arith.constant 0 : i32
    %c0_i32_1 = arith.constant 0 : i32
    return %c0_i32, %c0_i32_0 : i32, i32
  }
  func.func @transform_4(%arg0: i32) -> (i32, i32) {
    %c0_i32 = arith.constant 0 : i32
    %c0_i32_0 = arith.constant 0 : i32
    return %arg0, %c0_i32 : i32, i32
  }
}

</mosaic_0001>

<bundles_post_ra>
// kernel: tpu_custom_call.1
= control target key start
LH: loop header
LB: loop body
LE: loop exit
PB: predicated region body
PF: predicated region fallthrough
CT: control target
= control target key end

     0   :  { %9 = vsyncpa [#allocation3], 0  ;;  %s937_s0 = inlined_call_operand.hbm [shape: f32[32,128], index: 0, kind: input, shape index: {}]   ;;  %s938_s1 = inlined_call_operand.hbm [shape: f32[1,128], index: 1, kind: input, shape index: {}]   ;;  %s939_s2 = inlined_call_operand.vmem [shape: f32[1,128], index: 2, kind: input, shape index: {}]   ;;  %s940_s3 = inlined_call_operand.hbm [shape: f32[128,384], index: 3, kind: input, shape index: {}]   ;;  %s941_s4 = inlined_call_operand.hbm [shape: f32[32,384], index: 4, kind: output, shape index: {}]  }
   0x1   :  { %11 = vsyncpa [#allocation3 + $0x1], 0 }
   0x2   :  { %12 = vsyncpa [#allocation6], 0 }
   0x3   :  { %13 = vsyncpa [#allocation4], 0 }
   0x4   :  { %15 = vsyncpa [#allocation4 + $0x1], 0  ;;  %s785_s15 = smov 0   ;;  %s787_s16 = smov 0  }
   0x5   :  { %s789_s17 = smov 0   ;;  %s791_s18 = smov 0  }
   0x6 LB: > { %s806_s19 = sadd.s32 4294967295, %s753_s18   ;;  %s501_s20 = sadd.s32 4294967294, %s753_s18   ;;  %s753_s18 = sphi %s791_s18, %s950_s18   ;;  %s749_s17 = sphi %s789_s17, %s949_s17   ;;  %s745_s16 = sphi %s787_s16, %s948_s16   ;;  %s741_s15 = sphi %s785_s15, %s947_s15  }
   0x7   : > { %p41_p0 = scmp.ne.s32.totalorder %s745_s16, %s741_s15  ;;  %p42_p1 = scmp.eq.s32.totalorder %s806_s19, 0 }
   0x8   : > { %p128_p2 = scmp.eq.s32.totalorder %s806_s19, 3  ;;  %p134_p3 = scmp.eq.s32.totalorder %s501_s20, 3 }
   0x9   : > { %p815_p4 = por %p42_p1, %p41_p0  ;;  %p502_p5 = scmp.ge.s32.totalorder %s753_s18, 1 }
   0xa   : > { %p820_p6 = por %p134_p3, %p41_p0  ;;  %p141_p7 = scmp.lt.s32.totalorder %s753_s18, 5 }
   0xb   : > { %s153_s25 = sshll.u32 %s938_s1, 4  ;;  %s755_s27 = smov [#allocation5]   ;;  %s154_s25 = int_to_ptr.hbm [resolvable:$true] %s153_s25 }
   0xc   : > { %p828_p8 = pnand %p502_p5, %p141_p7  ;;  %s155_s28 = sshll.u32 %s755_s27, 4  ;;  %s156_s28 = int_to_ptr.vmem [resolvable:$true] %s155_s28 }
   0xd   : > { %s167_s5 = sshll.u32 %s940_s3, 4  ;;  %s756_s6 = smov [#allocation7]   ;;  %s168_s5 = int_to_ptr.hbm [resolvable:$true] %s167_s5 }
   0xe   : > { %p529_p9 = pneg %p828_p8  ;;  %s169_s7 = sshll.u32 %s756_s6, 4  ;;  %s170_s7 = int_to_ptr.vmem [resolvable:$true] %s169_s7 }
   0xf   : > { %s757_s8 = smov 384   ;;  %s758_s9 = smov 24  }
  0x10   : > { %p530_p10 = pnand %p529_p9, %p42_p1  ;;  %s840_s10 = sadd.s32 1, %s753_s18  }
  0x11   : > { %s25_s11 = ssub.s32 %s753_s18, %s840_s10  ;;  %s28_s12 = sadd.s32 1, %s749_s17 }
  0x12   : > { %532 = dma.hbm_to_vmem [thread:$0]  (!%p530_p10), %s154_s25, 16, %s156_s28, [#allocation6]  }
  0x13   : > { %535 = dma.hbm_to_vmem [thread:$0]  (!%p530_p10), %s168_s5, 6144, %s170_s7, [#allocation6], %s757_s8, %s757_s8, %s758_s9  }
  0x14   : > { %p26_p11 = scmp.eq.s32.totalorder %s25_s11, 0  ;;  %p35_p12 = scmp.ne.s32.totalorder %s749_s17, %s745_s16 }
  0x15   : > { %p36_p13 = scmp.eq.s32.totalorder %s753_s18, 0  ;;  %p546_p5 = scmp.lt.s32.totalorder %s753_s18, 4 }
  0x16   : > { %s849_s13 = scalar_select %p26_p11, %s749_s17, %s28_s12  }
  0x17   : > { %p37_p0 = por %p36_p13, %p35_p12  ;;  %p853_p3 = por %p128_p2, %p35_p12 }
  0x18   : > { %s183_s20 = sand.u32 1, %s749_s17   ;;  %s507_s24 = sshll.u32 %s753_s18, 3 }
  0x19   : > { %s506_s23 = sshll.u32 %s183_s20, 3  ;;  %s191_s28 = scalar_lea.hbm %s937_s0, %s507_s24 }
  0x1a   : > { %s187_s29 = scalar_lea.vmem [#allocation2], %s506_s23  ;;  %s193_s5 = sshll.u32 %s191_s28, 4  ;;  %s194_s5 = int_to_ptr.hbm [resolvable:$true] %s193_s5 }
  0x1b   : > { %s195_s30 = sshll.u32 %s187_s29, 4  ;;  %p863_p7 = pnand %p546_p5, %p37_p0  ;;  %s196_s30 = int_to_ptr.vmem [resolvable:$true] %s195_s30 }
  0x1c   : > { %s184_s7 = scalar_lea.sflag [#allocation3], %s183_s20  ;;  %s653_s8 = sshra.s32 %s194_s5, 4  ;;  %s654_s8 = int_to_ptr.hbm [resolvable:$true] %s653_s8 }
  0x1d   : > { %s655_s9 = scalar_lea.hbm %s654_s8, 8  ;;  %p657_p9 = pneg %p863_p7 }
  0x1e   : > { %p656_p2 = scmp.ne.s32.totalorder %s654_s8, %s655_s9  ;;  %s660_s23 = scalar_lea.hbm %s937_s0, 32 }
  0x1f   : > { %p661_p12 = scmp.lt.s32.totalorder %s654_s8, %s937_s0  ;;  %p662_p13 = scmp.lt.s32.totalorder %s660_s23, %s655_s9 }
  0x20   : > { %p658_p10 = pnand %p657_p9, %p656_p2 }
  0x21   : > { %p663_p0 = por %p662_p13, %p661_p12 }
  0x22   : > { %p659_p11 = pneg %p658_p10 }
  0x24   : > { %p664_p5 = pnand %p663_p0, %p659_p11 }
  0x26   : > { %667 = shalt.err (!%p664_p5)
}
  0x27   : > { %539 = dma.hbm_to_vmem [thread:$0]  (!%p863_p7), %s194_s5, 128, %s196_s30, %s184_s7  }
  0x28   : > { %204 = sbr.rel (%p828_p8) target bundleno = 451 (0x1c3), region = 36  ;;  %s880_s20 = sand.u32 (!%p828_p8), 1, %s745_s16  }
  0x29   : > { %s509_s27 = sshll.u32 (!%p828_p8), %s880_s20, 3  ;;  %s207_s28 = scalar_lea.sflag (!%p828_p8), [#allocation3], %s880_s20 }
  0x2a   : > { %s210_s29 = scalar_lea.vmem (!%p828_p8), [#allocation2], %s509_s27 }
  0x2d   : > { %728 = dma.done.wait (%p815_p4), %s207_s28, 128  }
  0x2e   : > { %730 = vsyncadd (%p815_p4), %s207_s28, 4294967168 }
  0x2f   : > { %732 = dma.done.wait (%p42_p1), [#allocation6], 6160  }
  0x30   : > { %734 = vsyncadd (%p42_p1), [#allocation6], 4294961136  ;;  %v246_v0 = vld [vmem:[%s210_s29] sm:$0xff]  ;;  %v759_v1 = vmov 128.0   ;;  %v328_v7 = vld [vmem:[#allocation7 + $0x160] sm:$0xff]  ;;  %s515_s30 = smul.u32 24, %s880_s20 }
  0x31   : > { %249 = vadd.xlane.f32.xlu0 %v246_v0  ;;  %589 = vrcp.f32 %v759_v1  ;;  %v329_v2 = vld [vmem:[#allocation7 + $0x168] sm:$0xff]  ;;  %v330_v3 = vld [vmem:[#allocation7 + $0x170] sm:$0xff]  ;;  %v331_v4 = vld [vmem:[#allocation7 + $0x178] sm:$0xff]  ;;  %s516_s5 = smul.u32 24, %s806_s19  ;;  %s396_s23 = scalar_lea.sflag [#allocation4], %s880_s20 }
  0x32   : > { %332 = vmatpush.msra.mxu0 %v329_v2  ;;  %352 = vmatpush.msra.mxu1 %v330_v3  ;;  %v326_v5 = vld [vmem:[#allocation7 + $0x150] sm:$0xff]  ;;  %v327_v6 = vld [vmem:[#allocation7 + $0x158] sm:$0xff]  ;;  %v324_v19 = vld [vmem:[#allocation7 + $0x140] sm:$0xff]  ;;  %s245_s9 = scalar_lea.vmem [#allocation8], %s515_s30  ;;  %s703_s28 = scalar_lea.hbm %s941_s4, 96 }
  0x33   : > { %372 = vmatpush.msra.mxu2 %v331_v4  ;;  %v323_v18 = vld [vmem:[#allocation7 + $0x138] sm:$0xff]  ;;  %v325_v20 = vld [vmem:[#allocation7 + $0x148] sm:$0xff]  ;;  %v320_v21 = vld [vmem:[#allocation7 + $0x120] sm:$0xff]  ;;  %s407_s8 = scalar_lea.hbm %s941_s4, %s516_s5  ;;  %s409_s11 = sshll.u32 %s245_s9, 4  ;;  %s410_s11 = int_to_ptr.vmem [resolvable:$true] %s409_s11 }
  0x34   : > { %333 = vmatpush.msra.mxu0 %v326_v5  ;;  %353 = vmatpush.msra.mxu1 %v327_v6  ;;  %v321_v22 = vld [vmem:[#allocation7 + $0x128] sm:$0xff]  ;;  %v322_v23 = vld [vmem:[#allocation7 + $0x130] sm:$0xff]  ;;  %v319_v26 = vld [vmem:[#allocation7 + $0x118] sm:$0xff]  ;;  %s411_s12 = sshll.u32 %s407_s8, 4  ;;  %s412_s12 = int_to_ptr.hbm [resolvable:$true] %s411_s12 }
  0x35   : > { %373 = vmatpush.msra.mxu2 %v328_v7  ;;  %v317_v24 = vld [vmem:[#allocation7 + $0x108] sm:$0xff]  ;;  %v318_v25 = vld [vmem:[#allocation7 + $0x110] sm:$0xff]  ;;  %v315_v28 = vld [vmem:[#allocation7 + $0xf8] sm:$0xff]  ;;  %s697_s24 = sshra.s32 %s412_s12, 4  ;;  %s698_s24 = int_to_ptr.hbm [resolvable:$true] %s697_s24 }
  0x36   : > { %334 = vmatpush.msra.mxu0 %v323_v18  ;;  %354 = vmatpush.msra.mxu1 %v324_v19  ;;  %v314_v27 = vld [vmem:[#allocation7 + $0xf0] sm:$0xff]  ;;  %v316_v29 = vld [vmem:[#allocation7 + $0x100] sm:$0xff]  ;;  %v311_v30 = vld [vmem:[#allocation7 + $0xd8] sm:$0xff]  ;;  %s699_s19 = scalar_lea.hbm %s698_s24, 24  ;;  %p704_p7 = scmp.lt.s32.totalorder %s698_s24, %s941_s4 }
  0x37   : > { %v590_v8 = vpop.eup %589  ;;  %374 = vmatpush.msra.mxu2 %v325_v20  ;;  %v312_v31 = vld [vmem:[#allocation7 + $0xe0] sm:$0xff]  ;;  %v313_v32 = vld [vmem:[#allocation7 + $0xe8] sm:$0xff]  ;;  %v310_v35 = vld [vmem:[#allocation7 + $0xd0] sm:$0xff]  ;;  %p700_p1 = scmp.ne.s32.totalorder %s698_s24, %s699_s19  ;;  %p705_p2 = scmp.lt.s32.totalorder %s703_s28, %s699_s19 }
  0x38   : > { %v252_v9 = vmul.f32 128.0, %v590_v8  ;;  %vm256_vm0 = vweird.f32 %v590_v8  ;;  %335 = vmatpush.msra.mxu0 %v320_v21  ;;  %355 = vmatpush.msra.mxu1 %v321_v22  ;;  %v308_v33 = vld [vmem:[#allocation7 + $0xc0] sm:$0xff]  ;;  %v309_v34 = vld [vmem:[#allocation7 + $0xc8] sm:$0xff]  ;;  %v306_v37 = vld [vmem:[#allocation7 + $0xb0] sm:$0xff] }
  0x39   : > { %375 = vmatpush.msra.mxu2 %v322_v23  ;;  %v305_v36 = vld [vmem:[#allocation7 + $0xa8] sm:$0xff]  ;;  %v307_v38 = vld [vmem:[#allocation7 + $0xb8] sm:$0xff]  ;;  %v302_v39 = vld [vmem:[#allocation7 + $0x90] sm:$0xff]  ;;  %p701_p4 = pnand %p700_p1, %p853_p3  ;;  %p706_p9 = por %p705_p2, %p704_p7 }
  0x3a   : > { %v253_v10 = vsub.f32 1.0, %v252_v9  ;;  %336 = vmatpush.msra.mxu0 %v317_v24  ;;  %356 = vmatpush.msra.mxu1 %v318_v25  ;;  %v303_v40 = vld [vmem:[#allocation7 + $0x98] sm:$0xff]  ;;  %v304_v41 = vld [vmem:[#allocation7 + $0xa0] sm:$0xff]  ;;  %v301_v44 = vld [vmem:[#allocation7 + $0x88] sm:$0xff] }
  0x3b   : > { %376 = vmatpush.msra.mxu2 %v319_v26  ;;  %v299_v42 = vld [vmem:[#allocation7 + $0x78] sm:$0xff]  ;;  %v300_v43 = vld [vmem:[#allocation7 + $0x80] sm:$0xff]  ;;  %v297_v46 = vld [vmem:[#allocation7 + $0x68] sm:$0xff]  ;;  %p702_p8 = pneg %p701_p4 }
  0x3c   : > { %v254_v11 = vmul.f32 %v590_v8, %v253_v10  ;;  %337 = vmatpush.msra.mxu0 %v314_v27  ;;  %357 = vmatpush.msra.mxu1 %v315_v28  ;;  %v296_v45 = vld [vmem:[#allocation7 + $0x60] sm:$0xff]  ;;  %v298_v47 = vld [vmem:[#allocation7 + $0x70] sm:$0xff]  ;;  %v293_v48 = vld [vmem:[#allocation7 + $0x48] sm:$0xff] }
  0x3d   : > { %377 = vmatpush.msra.mxu2 %v316_v29  ;;  %v294_v49 = vld [vmem:[#allocation7 + $0x50] sm:$0xff]  ;;  %v295_v50 = vld [vmem:[#allocation7 + $0x58] sm:$0xff]  ;;  %v292_v53 = vld [vmem:[#allocation7 + $0x40] sm:$0xff]  ;;  %p707_p10 = pnand %p706_p9, %p702_p8 }
  0x3e   : > { %v255_v12 = vadd.f32 %v590_v8, %v254_v11  ;;  %338 = vmatpush.msra.mxu0 %v311_v30  ;;  %358 = vmatpush.msra.mxu1 %v312_v31  ;;  %v290_v51 = vld [vmem:[#allocation7 + $0x30] sm:$0xff]  ;;  %v291_v52 = vld [vmem:[#allocation7 + $0x38] sm:$0xff]  ;;  %v288_v55 = vld [vmem:[#allocation7 + $0x20] sm:$0xff] }
  0x3f   : > { %378 = vmatpush.msra.mxu2 %v313_v32  ;;  %v287_v54 = vld [vmem:[#allocation7 + $0x18] sm:$0xff]  ;;  %v289_v56 = vld [vmem:[#allocation7 + $0x28] sm:$0xff]  ;;  %v284_v57 = vld [vmem:[#allocation7] sm:$0xff] }
  0x40   : > { %v892_v13 = vsel %vm256_vm0, %v590_v8, %v255_v12  ;;  %339 = vmatpush.msra.mxu0 %v308_v33  ;;  %359 = vmatpush.msra.mxu1 %v309_v34  ;;  %v285_v58 = vld [vmem:[#allocation7 + $0x8] sm:$0xff]  ;;  %v286_v59 = vld [vmem:[#allocation7 + $0x10] sm:$0xff]  ;;  %v587_v5 = vld [vmem:[#allocation5] ss:$0 sm:$0xff] }
  0x41   : > { %379 = vmatpush.msra.mxu2 %v310_v35  ;;  %v588_v8 = vld [vmem:[%s939_s2] ss:$0 sm:$0xff] }
  0x42   : > { %340 = vmatpush.msra.mxu0 %v305_v36  ;;  %360 = vmatpush.msra.mxu1 %v306_v37 }
  0x43   : > { %380 = vmatpush.msra.mxu2 %v307_v38 }
  0x44   : > { %341 = vmatpush.msra.mxu0 %v302_v39  ;;  %361 = vmatpush.msra.mxu1 %v303_v40 }
  0x45   : > { %381 = vmatpush.msra.mxu2 %v304_v41 }
  0x46   : > { %342 = vmatpush.msra.mxu0 %v299_v42  ;;  %362 = vmatpush.msra.mxu1 %v300_v43 }
  0x47   : > { %382 = vmatpush.msra.mxu2 %v301_v44 }
  0x48   : > { %343 = vmatpush.msra.mxu0 %v296_v45  ;;  %363 = vmatpush.msra.mxu1 %v297_v46 }
  0x49   : > { %383 = vmatpush.msra.mxu2 %v298_v47 }
  0x4a   : > { %344 = vmatpush.msra.mxu0 %v293_v48  ;;  %364 = vmatpush.msra.mxu1 %v294_v49 }
  0x4b   : > { %384 = vmatpush.msra.mxu2 %v295_v50 }
  0x4c   : > { %345 = vmatpush.msra.mxu0 %v290_v51  ;;  %365 = vmatpush.msra.mxu1 %v291_v52 }
  0x4d   : > { %385 = vmatpush.msra.mxu2 %v292_v53 }
  0x4e   : > { %346 = vmatpush.msra.mxu0 %v287_v54  ;;  %366 = vmatpush.msra.mxu1 %v288_v55 }
  0x4f   : > { %386 = vmatpush.msra.mxu2 %v289_v56 }
  0x50   : > { %347 = vmatpush.msra.mxu0 %v284_v57  ;;  %367 = vmatpush.msra.mxu1 %v285_v58 }
  0x51   : > { %387 = vmatpush.msra.mxu2 %v286_v59 }
  0xa4   : > { %v250_v14 = vpop.xlane.xlu0 %249 }
  0xa5   : > { %v258_v15 = vmul.f32 %v892_v13, %v250_v14 }
  0xa7   : > { %v895_v16 = vsub.f32 %v246_v0, %v258_v15 }
  0xa9   : > { %v260_v17 = vmul.f32 %v895_v16, %v895_v16 }
  0xab   : > { %261 = vadd.xlane.f32.xlu0 %v260_v17 }
 0x11e   : > { %v262_v60 = vpop.xlane.xlu0 %261 }
 0x11f   : > { %v263_v61 = vmul.f32 %v262_v60, %v892_v13 }
 0x121   : > { %v264_v62 = vadd.f32 1e-06, %v263_v61 }
 0x123   : > { %591 = vrsqrt.f32 %v264_v62  ;;  %vm271_vm2 = vweird.f32 %v264_v62 }
 0x129   : > { %v592_v63 = vpop.eup %591 }
 0x12a   : > { %v266_v0 = vmul.f32 %v592_v63, %v264_v62  ;;  %vm272_vm1 = vweird.f32 %v592_v63 }
 0x12b   : > { %vm273_vm3 = vmor %vm271_vm2, %vm272_vm1 }
 0x12c   : > { %v267_v1 = vmul.f32 %v592_v63, %v266_v0 }
 0x12e   : > { %v268_v2 = vmul.f32 0.5, %v267_v1 }
 0x130   : > { %v269_v3 = vsub.f32 1.5, %v268_v2 }
 0x132   : > { %v270_v4 = vmul.f32 %v592_v63, %v269_v3 }
 0x134   : > { %v274_v6 = vsel %vm273_vm3, %v592_v63, %v270_v4 }
 0x135   : > { %v275_v7 = vmul.f32 %v274_v6, %v895_v16 }
 0x137   : > { %v279_v9 = vmul.f32 %v587_v5, %v275_v7 }
 0x139   : > { %v283_v10 = vadd.f32 %v588_v8, %v279_v9 }
 0x13b   : > { %348 = vmatmul.f32.vlgmr.msra.gmra.mxu0 %v283_v10  ;;  %368 = vmatmul.f32.vlgmr.msra.gmra.mxu1 %v283_v10 }
 0x13c   : > { %388 = vmatmul.f32.vlgmr.msra.gmra.mxu2 %v283_v10 }
 0x1b8   : > { %v349_v11 = vpop.f32.mrf.mxu0  ;;  %v369_v12 = vpop.f32.mrf.mxu1 }
 0x1b9   : > { %392 = vst [vmem:[%s245_s9] sm:$0xff] %v349_v11 }
 0x1ba   : > { %393 = vst [vmem:[%s245_s9 + $0x8] sm:$0xff] %v369_v12 }
 0x1bf   : > { %v389_v13 = vpop.f32.mrf.mxu2 }
 0x1c0   : > { %394 = vst [vmem:[%s245_s9 + $0x10] sm:$0xff] %v389_v13 }
 0x1c1   : > { %710 = shalt.err (!%p707_p10)
}
 0x1c2   : > { %527 = dma.vmem_to_hbm [thread:$0]  (%p853_p3), %s410_s11, 384, %s412_s12, %s396_s23  }
 0x1c3 PF: > { %p549_p11 = scmp.ge.s32.totalorder %s753_s18, 2  ;;  %s423_s20 = sand.u32 1, %s741_s15  }
 0x1c4   : > { %s424_s26 = scalar_lea.sflag [#allocation4], %s423_s20 }
 0x1c5   : > { %p541_p12 = pnand %p549_p11, %p820_p6 }
 0x1c7   : > { %p542_p13 = pneg %p541_p12 }
 0x1c9   : > { %736 = dma.done.wait (%p542_p13), %s424_s26, 384  }
 0x1ca   : > { %738 = vsyncadd (%p542_p13), %s424_s26, 4294966912  ;;  %p18_p0 = scmp.ge.s32.totalorder %s840_s10, 6   ;;  %s947_s15 = smov %s745_s16 }
 0x1cb   : > { %s948_s16 = smov %s749_s17  ;;  %s949_s17 = smov %s849_s13 }
 0x1cc   : > { %s950_s18 = smov %s840_s10  ;;  %20 = sbr.rel (!%p18_p0) target bundleno = 6 (0x6), region = 89 }
 0x1d1   :  { %430 = vsyncpa [#allocation3], 1 }
 0x1d2   :  { %432 = vsyncpa [#allocation3 + $0x1], 1 }
 0x1d3   :  { %433 = vsyncpa [#allocation6], 1 }
 0x1d4   :  { %434 = vsyncpa [#allocation4], 1 }
 0x1d5   :  { %436 = vsyncpa [#allocation4 + $0x1], 1 }

</bundles_post_ra>
